<compile_context>
chip_gen: v6e
topology: v6e:2x2x1
jax: 0.10.0
libtpu: 0.0.40
codegen_flags: <defaults>
</compile_context>

<pallas_src>
import functools

import jax
import jax.numpy as jnp
import numpy as np
from jax.experimental import pallas as pl
from jax.experimental.pallas import tpu as pltpu

_LANE_OFF = 128  # lane offset at which y1 is staged inside the padded scratch


def bottleneck_kernel(x_ref, w1_ref, w2_ref, w3_ref, b1_ref, b2_ref, b3_ref,
                      o_ref, y1pad_ref, stk_ref, *, H, W):
    # x_ref: (1, Cin, H*W)  with channels on sublanes, flattened spatial on lanes.
    Cin, HW = x_ref.shape[1], x_ref.shape[2]
    P = w1_ref.shape[0]
    G = w2_ref.shape[1] // 9          # sublane-aligned rows per 3x3 tap group

    x = x_ref[0]                      # (Cin, HW)

    # ---- conv1 (1x1, BN1 scale folded into w1) + shift + relu --------------
    y1 = jnp.dot(w1_ref[...], x, preferred_element_type=jnp.float32)
    y1 = jnp.maximum(y1 + b1_ref[...], 0.0)            # (P, HW)

    # Stage y1 in a lane-padded scratch so every 3x3 tap becomes a plain
    # shifted lane read (no roll / concat / reshape relayouts).
    y1pad_ref[...] = jnp.zeros_like(y1pad_ref)
    y1pad_ref[:, _LANE_OFF:_LANE_OFF + HW] = y1

    # ---- conv2 (3x3, valid) as ONE K = 9*G contraction ---------------------
    # stacked rows: tap t = 3*dh + dw occupies rows [t*G, t*G + P); the
    # remaining pad rows stay zero and match the zero-padded columns of w2.
    stk_ref[...] = jnp.zeros_like(stk_ref)
    for t, (dh, dw) in enumerate((a, b) for a in range(3) for b in range(3)):
        off = _LANE_OFF + (dh - 1) * W + (dw - 1)       # centered anchoring
        stk_ref[t * G:t * G + P, :] = y1pad_ref[:, off:off + HW]
    y2 = jnp.dot(w2_ref[...], stk_ref[...], preferred_element_type=jnp.float32)
    y2 = jnp.maximum(y2 + b2_ref[...], 0.0)             # (P, HW)

    # ---- conv3 (1x1, BN3 scale folded) + shift ------------------------------
    y3 = jnp.dot(w3_ref[...], y2, preferred_element_type=jnp.float32) + b3_ref[...]

    # ---- residual add + relu ------------------------------------------------
    # Thanks to the centered conv anchoring, the residual is just `x` here;
    # the [1:-1, 1:-1] spatial crop happens in the wrapper.
    o_ref[0] = jnp.maximum(y3 + x, 0.0)                 # (Cin, HW)


def bottleneck_nop_pallas(x_nchw, fused):
    """x_nchw: (N, Cin, H, W) float32 with Cin == 4*planes.
    Returns (N, Cin, H-2, W-2) float32 (PyTorch NCHW layout)."""
    N, Cin, H, W = x_nchw.shape
    w1f, w2f, w3f, b1, b2, b3 = fused
    P = w1f.shape[0]
    Cout = w3f.shape[0]
    assert Cout == Cin, "residual add requires inplanes == 4*planes"
    assert W + 1 <= _LANE_OFF, "spatial width too large for fixed lane padding"
    HW = H * W
    G = w2f.shape[1] // 9

    x_flat = x_nchw.reshape(N, Cin, HW)      # free bitcast; C-major layout

    full2d = lambda a: pl.BlockSpec(a.shape, lambda n: (0, 0))

    out_flat = pl.pallas_call(
        functools.partial(bottleneck_kernel, H=H, W=W),
        out_shape=jax.ShapeDtypeStruct((N, Cout, HW), jnp.float32),
        grid_spec=pltpu.PrefetchScalarGridSpec(
            num_scalar_prefetch=0,
            grid=(N,),
            in_specs=[
                pl.BlockSpec((1, Cin, HW), lambda n: (n, 0, 0)),   # x
                full2d(w1f), full2d(w2f), full2d(w3f),
                full2d(b1), full2d(b2), full2d(b3),
            ],
            out_specs=pl.BlockSpec((1, Cout, HW), lambda n: (n, 0, 0)),
            scratch_shapes=[
                pltpu.VMEM((P, HW + 2 * _LANE_OFF), jnp.float32),  # padded y1
                pltpu.VMEM((9 * G, HW), jnp.float32),              # tap stack
            ],
        ),
        compiler_params=pltpu.CompilerParams(
            dimension_semantics=("parallel",)),
    )(x_flat, w1f, w2f, w3f, b1, b2, b3)

    out = out_flat.reshape(N, Cout, H, W)
    return out[:, :, 1:H - 1, 1:W - 1]


def make_params(key, inplanes, planes, eps=1e-5):
    """Deterministic synthetic parameters.  Returns (fused kernel params,
    reference params with PyTorch-shaped weights + BN scale/shift)."""
    P = planes
    ks = jax.random.split(key, 15)
    w1_t = jax.random.normal(ks[0], (P, inplanes, 1, 1), jnp.float32) * 0.1
    w2_t = jax.random.normal(ks[1], (P, P, 3, 3), jnp.float32) * 0.1
    w3_t = jax.random.normal(ks[2], (P * 4, P, 1, 1), jnp.float32) * 0.1

    def bn(kg, kb, km, kv, c):
        gamma = 1.0 + 0.1 * jax.random.normal(kg, (c,), jnp.float32)
        beta = 0.1 * jax.random.normal(kb, (c,), jnp.float32)
        mean = 0.1 * jax.random.normal(km, (c,), jnp.float32)
        var = jnp.abs(jax.random.normal(kv, (c,), jnp.float32)) + 0.5
        scale = gamma / jnp.sqrt(var + eps)
        shift = beta - mean * scale
        return scale, shift

    s1, h1 = bn(ks[3], ks[4], ks[5], ks[6], P)
    s2, h2 = bn(ks[7], ks[8], ks[9], ks[10], P)
    s3, h3 = bn(ks[11], ks[12], ks[13], ks[14], P * 4)

    # ---- fused, C-major kernel weights (BN scales folded in) ---------------
    G = ((P + 7) // 8) * 8
    w1f = w1_t[:, :, 0, 0] * s1[:, None]                    # (P, Cin)
    w2r = jnp.transpose(w2_t, (0, 2, 3, 1)).reshape(P, 9, P)  # (P_out, tap, P_in)
    w2p = jnp.zeros((P, 9, G), jnp.float32).at[:, :, :P].set(w2r)
    w2f = w2p.reshape(P, 9 * G) * s2[:, None]               # (P, 9*G)
    w3f = w3_t[:, :, 0, 0] * s3[:, None]                    # (4P, P)
    b1, b2, b3 = h1[:, None], h2[:, None], h3[:, None]      # (c, 1) shifts

    fused = (w1f, w2f, w3f, b1, b2, b3)
    ref_params = (w1_t, w2_t, w3_t, s1, h1, s2, h2, s3, h3)
    return fused, ref_params


def reference_nchw(x, ref_params):
    """Plain-JAX NCHW reference matching the PyTorch forward (inference BN)."""
    w1_t, w2_t, w3_t, s1, h1, s2, h2, s3, h3 = ref_params

    def conv1x1(x, w):
        return jnp.einsum('nchw,oc->nohw', x, w[:, :, 0, 0])

    def conv3x3_valid(x, w):
        N, C, H, W = x.shape
        out = jnp.zeros((N, w.shape[0], H - 2, W - 2), jnp.float32)
        for dh in range(3):
            for dw in range(3):
                out = out + jnp.einsum('nchw,oc->nohw',
                                       x[:, :, dh:dh + H - 2, dw:dw + W - 2],
                                       w[:, :, dh, dw])
        return out

    def bn(x, s, h):
        return x * s[None, :, None, None] + h[None, :, None, None]

    out = jax.nn.relu(bn(conv1x1(x, w1_t), s1, h1))
    out = jax.nn.relu(bn(conv3x3_valid(out, w2_t), s2, h2))
    out = bn(conv1x1(out, w3_t), s3, h3)
    s = x.shape[3]
    residual = x[:, :, 1:s - 1, 1:s - 1]
    return jax.nn.relu(out + residual)


if __name__ == "__main__":
    key = jax.random.PRNGKey(0)
    N, planes, H = 2, 4, 16
    inplanes = planes * 4                       # required for the residual add
    kx, kp = jax.random.split(key)

    x_nchw = jax.random.normal(kx, (N, inplanes, H, H), jnp.float32)
    fused, ref_params = make_params(kp, inplanes, planes)

    out = bottleneck_nop_pallas(x_nchw, fused)  # NCHW in, NCHW out
    out = jax.block_until_ready(out)

    ref = jax.block_until_ready(reference_nchw(x_nchw, ref_params))
    np.testing.assert_allclose(np.asarray(out), np.asarray(ref),
                               rtol=1e-4, atol=1e-4)
    print("KERNEL_OK")
</pallas_src>

<mosaic_0001>
module attributes {stable_mosaic.version = 11 : i64} {
  func.func @bottleneck_kernel(%arg0: i32, %arg1: memref<1x16x256xf32, #tpu.memory_space<vmem>>, %arg2: memref<4x16xf32, #tpu.memory_space<vmem>>, %arg3: memref<4x72xf32, #tpu.memory_space<vmem>>, %arg4: memref<16x4xf32, #tpu.memory_space<vmem>>, %arg5: memref<4x1xf32, #tpu.memory_space<vmem>>, %arg6: memref<4x1xf32, #tpu.memory_space<vmem>>, %arg7: memref<16x1xf32, #tpu.memory_space<vmem>>, %arg8: memref<1x16x256xf32, #tpu.memory_space<vmem>>, %arg9: memref<4x512xf32, #tpu.memory_space<vmem>>, %arg10: memref<72x256xf32, #tpu.memory_space<vmem>>) attributes {dimension_semantics = [#tpu.dimension_semantics<parallel>], iteration_bounds = array<i64: 2>, scalar_prefetch = 0 : i64, scratch_operands = 2 : i64, tpu.core_type = #tpu.core_type<tc>, window_params = [{transform_indices = @transform_0, window_bounds = array<i64: 1, 16, 256>}, {pipeline_mode = #tpu.pipeline_mode<synchronous>, transform_indices = @transform_1, window_bounds = array<i64: 4, 16>}, {pipeline_mode = #tpu.pipeline_mode<synchronous>, transform_indices = @transform_2, window_bounds = array<i64: 4, 72>}, {pipeline_mode = #tpu.pipeline_mode<synchronous>, transform_indices = @transform_3, window_bounds = array<i64: 16, 4>}, {pipeline_mode = #tpu.pipeline_mode<synchronous>, transform_indices = @transform_4, window_bounds = array<i64: 4, 1>}, {pipeline_mode = #tpu.pipeline_mode<synchronous>, transform_indices = @transform_5, window_bounds = array<i64: 4, 1>}, {pipeline_mode = #tpu.pipeline_mode<synchronous>, transform_indices = @transform_6, window_bounds = array<i64: 16, 1>}, {transform_indices = @transform_7, window_bounds = array<i64: 1, 16, 256>}]} {
    %c0 = arith.constant 0 : index
    %c0_0 = arith.constant 0 : index
    %c0_1 = arith.constant 0 : index
    %0 = vector.load %arg1[%c0, %c0_0, %c0_1] : memref<1x16x256xf32, #tpu.memory_space<vmem>>, vector<1x16x256xf32>
    %1 = vector.shape_cast %0 : vector<1x16x256xf32> to vector<16x256xf32>
    %c0_2 = arith.constant 0 : index
    %c0_3 = arith.constant 0 : index
    %2 = vector.load %arg2[%c0_2, %c0_3] : memref<4x16xf32, #tpu.memory_space<vmem>>, vector<4x16xf32>
    %cst = arith.constant dense<0.000000e+00> : vector<4x256xf32>
    %3 = tpu.matmul %2, %1, %cst {dimension_numbers = #tpu.dot_dimension_numbers<[1], [0], [0], [1], [0, 0, 1, 1], [], []>} : vector<4x16xf32>, vector<16x256xf32>, vector<4x256xf32> -> vector<4x256xf32>
    %c0_4 = arith.constant 0 : index
    %c0_5 = arith.constant 0 : index
    %4 = vector.load %arg5[%c0_4, %c0_5] : memref<4x1xf32, #tpu.memory_space<vmem>>, vector<4x1xf32>
    %5 = vector.broadcast %4 : vector<4x1xf32> to vector<4x256xf32>
    %6 = arith.addf %3, %5 : vector<4x256xf32>
    %cst_6 = arith.constant 0.000000e+00 : f32
    %7 = vector.broadcast %cst_6 : f32 to vector<4x256xf32>
    %8 = arith.maximumf %6, %7 : vector<4x256xf32>
    %cst_7 = arith.constant 0.000000e+00 : f32
    %9 = vector.broadcast %cst_7 : f32 to vector<4x512xf32>
    %c0_8 = arith.constant 0 : index
    %c0_9 = arith.constant 0 : index
    %10 = vector.load %arg9[%c0_8, %c0_9] : memref<4x512xf32, #tpu.memory_space<vmem>>, vector<4x512xf32>
    tpu.vector_store %arg9[%c0_8, %c0_9], %9 {strides = array<i32>} : memref<4x512xf32, #tpu.memory_space<vmem>>, vector<4x512xf32>,
    %c0_10 = arith.constant 0 : index
    %c128 = arith.constant 128 : index
    %11 = vector.load %arg9[%c0_10, %c128] : memref<4x512xf32, #tpu.memory_space<vmem>>, vector<4x256xf32>
    tpu.vector_store %arg9[%c0_10, %c128], %8 {strides = array<i32>} : memref<4x512xf32, #tpu.memory_space<vmem>>, vector<4x256xf32>,
    %cst_11 = arith.constant 0.000000e+00 : f32
    %12 = vector.broadcast %cst_11 : f32 to vector<72x256xf32>
    %c0_12 = arith.constant 0 : index
    %c0_13 = arith.constant 0 : index
    %13 = vector.load %arg10[%c0_12, %c0_13] : memref<72x256xf32, #tpu.memory_space<vmem>>, vector<72x256xf32>
    tpu.vector_store %arg10[%c0_12, %c0_13], %12 {strides = array<i32>} : memref<72x256xf32, #tpu.memory_space<vmem>>, vector<72x256xf32>,
    %c0_14 = arith.constant 0 : index
    %c111 = arith.constant 111 : index
    %14 = vector.load %arg9[%c0_14, %c111] : memref<4x512xf32, #tpu.memory_space<vmem>>, vector<4x256xf32>
    %c0_15 = arith.constant 0 : index
    %c0_16 = arith.constant 0 : index
    %15 = vector.load %arg10[%c0_15, %c0_16] : memref<72x256xf32, #tpu.memory_space<vmem>>, vector<4x256xf32>
    tpu.vector_store %arg10[%c0_15, %c0_16], %14 {strides = array<i32>} : memref<72x256xf32, #tpu.memory_space<vmem>>, vector<4x256xf32>,
    %c0_17 = arith.constant 0 : index
    %c112 = arith.constant 112 : index
    %16 = vector.load %arg9[%c0_17, %c112] : memref<4x512xf32, #tpu.memory_space<vmem>>, vector<4x256xf32>
    %c8 = arith.constant 8 : index
    %c0_18 = arith.constant 0 : index
    %17 = vector.load %arg10[%c8, %c0_18] : memref<72x256xf32, #tpu.memory_space<vmem>>, vector<4x256xf32>
    tpu.vector_store %arg10[%c8, %c0_18], %16 {strides = array<i32>} : memref<72x256xf32, #tpu.memory_space<vmem>>, vector<4x256xf32>,
    %c0_19 = arith.constant 0 : index
    %c113 = arith.constant 113 : index
    %18 = vector.load %arg9[%c0_19, %c113] : memref<4x512xf32, #tpu.memory_space<vmem>>, vector<4x256xf32>
    %c16 = arith.constant 16 : index
    %c0_20 = arith.constant 0 : index
    %19 = vector.load %arg10[%c16, %c0_20] : memref<72x256xf32, #tpu.memory_space<vmem>>, vector<4x256xf32>
    tpu.vector_store %arg10[%c16, %c0_20], %18 {strides = array<i32>} : memref<72x256xf32, #tpu.memory_space<vmem>>, vector<4x256xf32>,
    %c0_21 = arith.constant 0 : index
    %c127 = arith.constant 127 : index
    %20 = vector.load %arg9[%c0_21, %c127] : memref<4x512xf32, #tpu.memory_space<vmem>>, vector<4x256xf32>
    %c24 = arith.constant 24 : index
    %c0_22 = arith.constant 0 : index
    %21 = vector.load %arg10[%c24, %c0_22] : memref<72x256xf32, #tpu.memory_space<vmem>>, vector<4x256xf32>
    tpu.vector_store %arg10[%c24, %c0_22], %20 {strides = array<i32>} : memref<72x256xf32, #tpu.memory_space<vmem>>, vector<4x256xf32>,
    %c0_23 = arith.constant 0 : index
    %c128_24 = arith.constant 128 : index
    %22 = vector.load %arg9[%c0_23, %c128_24] : memref<4x512xf32, #tpu.memory_space<vmem>>, vector<4x256xf32>
    %c32 = arith.constant 32 : index
    %c0_25 = arith.constant 0 : index
    %23 = vector.load %arg10[%c32, %c0_25] : memref<72x256xf32, #tpu.memory_space<vmem>>, vector<4x256xf32>
    tpu.vector_store %arg10[%c32, %c0_25], %22 {strides = array<i32>} : memref<72x256xf32, #tpu.memory_space<vmem>>, vector<4x256xf32>,
    %c0_26 = arith.constant 0 : index
    %c129 = arith.constant 129 : index
    %24 = vector.load %arg9[%c0_26, %c129] : memref<4x512xf32, #tpu.memory_space<vmem>>, vector<4x256xf32>
    %c40 = arith.constant 40 : index
    %c0_27 = arith.constant 0 : index
    %25 = vector.load %arg10[%c40, %c0_27] : memref<72x256xf32, #tpu.memory_space<vmem>>, vector<4x256xf32>
    tpu.vector_store %arg10[%c40, %c0_27], %24 {strides = array<i32>} : memref<72x256xf32, #tpu.memory_space<vmem>>, vector<4x256xf32>,
    %c0_28 = arith.constant 0 : index
    %c143 = arith.constant 143 : index
    %26 = vector.load %arg9[%c0_28, %c143] : memref<4x512xf32, #tpu.memory_space<vmem>>, vector<4x256xf32>
    %c48 = arith.constant 48 : index
    %c0_29 = arith.constant 0 : index
    %27 = vector.load %arg10[%c48, %c0_29] : memref<72x256xf32, #tpu.memory_space<vmem>>, vector<4x256xf32>
    tpu.vector_store %arg10[%c48, %c0_29], %26 {strides = array<i32>} : memref<72x256xf32, #tpu.memory_space<vmem>>, vector<4x256xf32>,
    %c0_30 = arith.constant 0 : index
    %c144 = arith.constant 144 : index
    %28 = vector.load %arg9[%c0_30, %c144] : memref<4x512xf32, #tpu.memory_space<vmem>>, vector<4x256xf32>
    %c56 = arith.constant 56 : index
    %c0_31 = arith.constant 0 : index
    %29 = vector.load %arg10[%c56, %c0_31] : memref<72x256xf32, #tpu.memory_space<vmem>>, vector<4x256xf32>
    tpu.vector_store %arg10[%c56, %c0_31], %28 {strides = array<i32>} : memref<72x256xf32, #tpu.memory_space<vmem>>, vector<4x256xf32>,
    %c0_32 = arith.constant 0 : index
    %c145 = arith.constant 145 : index
    %30 = vector.load %arg9[%c0_32, %c145] : memref<4x512xf32, #tpu.memory_space<vmem>>, vector<4x256xf32>
    %c64 = arith.constant 64 : index
    %c0_33 = arith.constant 0 : index
    %31 = vector.load %arg10[%c64, %c0_33] : memref<72x256xf32, #tpu.memory_space<vmem>>, vector<4x256xf32>
    tpu.vector_store %arg10[%c64, %c0_33], %30 {strides = array<i32>} : memref<72x256xf32, #tpu.memory_space<vmem>>, vector<4x256xf32>,
    %c0_34 = arith.constant 0 : index
    %c0_35 = arith.constant 0 : index
    %32 = vector.load %arg3[%c0_34, %c0_35] : memref<4x72xf32, #tpu.memory_space<vmem>>, vector<4x72xf32>
    %c0_36 = arith.constant 0 : index
    %c0_37 = arith.constant 0 : index
    %33 = vector.load %arg10[%c0_36, %c0_37] : memref<72x256xf32, #tpu.memory_space<vmem>>, vector<72x256xf32>
    %cst_38 = arith.constant dense<0.000000e+00> : vector<4x256xf32>
    %34 = tpu.matmul %32, %33, %cst_38 {dimension_numbers = #tpu.dot_dimension_numbers<[1], [0], [0], [1], [0, 0, 1, 1], [], []>} : vector<4x72xf32>, vector<72x256xf32>, vector<4x256xf32> -> vector<4x256xf32>
    %c0_39 = arith.constant 0 : index
    %c0_40 = arith.constant 0 : index
    %35 = vector.load %arg6[%c0_39, %c0_40] : memref<4x1xf32, #tpu.memory_space<vmem>>, vector<4x1xf32>
    %36 = vector.broadcast %35 : vector<4x1xf32> to vector<4x256xf32>
    %37 = arith.addf %34, %36 : vector<4x256xf32>
    %cst_41 = arith.constant 0.000000e+00 : f32
    %38 = vector.broadcast %cst_41 : f32 to vector<4x256xf32>
    %39 = arith.maximumf %37, %38 : vector<4x256xf32>
    %c0_42 = arith.constant 0 : index
    %c0_43 = arith.constant 0 : index
    %40 = vector.load %arg4[%c0_42, %c0_43] : memref<16x4xf32, #tpu.memory_space<vmem>>, vector<16x4xf32>
    %cst_44 = arith.constant dense<0.000000e+00> : vector<16x256xf32>
    %41 = tpu.matmul %40, %39, %cst_44 {dimension_numbers = #tpu.dot_dimension_numbers<[1], [0], [0], [1], [0, 0, 1, 1], [], []>} : vector<16x4xf32>, vector<4x256xf32>, vector<16x256xf32> -> vector<16x256xf32>
    %c0_45 = arith.constant 0 : index
    %c0_46 = arith.constant 0 : index
    %42 = vector.load %arg7[%c0_45, %c0_46] : memref<16x1xf32, #tpu.memory_space<vmem>>, vector<16x1xf32>
    %43 = vector.broadcast %42 : vector<16x1xf32> to vector<16x256xf32>
    %44 = arith.addf %41, %43 : vector<16x256xf32>
    %45 = arith.addf %44, %1 : vector<16x256xf32>
    %cst_47 = arith.constant 0.000000e+00 : f32
    %46 = vector.broadcast %cst_47 : f32 to vector<16x256xf32>
    %47 = arith.maximumf %45, %46 : vector<16x256xf32>
    %c0_48 = arith.constant 0 : index
    %c0_49 = arith.constant 0 : index
    %c0_50 = arith.constant 0 : index
    %48 = vector.load %arg8[%c0_48, %c0_49, %c0_50] : memref<1x16x256xf32, #tpu.memory_space<vmem>>, vector<1x16x256xf32>
    %49 = vector.shape_cast %48 : vector<1x16x256xf32> to vector<16x256xf32>
    %50 = vector.shape_cast %47 : vector<16x256xf32> to vector<1x16x256xf32>
    tpu.vector_store %arg8[%c0_48, %c0_49, %c0_50], %50 {strides = array<i32>} : memref<1x16x256xf32, #tpu.memory_space<vmem>>, vector<1x16x256xf32>,
    return
  }
  func.func @transform_0(%arg0: i32) -> (i32, i32, i32) {
    %c0_i32 = arith.constant 0 : i32
    %c0_i32_0 = arith.constant 0 : i32
    %c0_i32_1 = arith.constant 0 : i32
    return %arg0, %c0_i32, %c0_i32_0 : i32, i32, i32
  }
  func.func @transform_1(%arg0: i32) -> (i32, i32) {
    %c0_i32 = arith.constant 0 : i32
    %c0_i32_0 = arith.constant 0 : i32
    %c0_i32_1 = arith.constant 0 : i32
    return %c0_i32, %c0_i32_0 : i32, i32
  }
  func.func @transform_2(%arg0: i32) -> (i32, i32) {
    %c0_i32 = arith.constant 0 : i32
    %c0_i32_0 = arith.constant 0 : i32
    %c0_i32_1 = arith.constant 0 : i32
    return %c0_i32, %c0_i32_0 : i32, i32
  }
  func.func @transform_3(%arg0: i32) -> (i32, i32) {
    %c0_i32 = arith.constant 0 : i32
    %c0_i32_0 = arith.constant 0 : i32
    %c0_i32_1 = arith.constant 0 : i32
    return %c0_i32, %c0_i32_0 : i32, i32
  }
  func.func @transform_4(%arg0: i32) -> (i32, i32) {
    %c0_i32 = arith.constant 0 : i32
    %c0_i32_0 = arith.constant 0 : i32
    %c0_i32_1 = arith.constant 0 : i32
    return %c0_i32, %c0_i32_0 : i32, i32
  }
  func.func @transform_5(%arg0: i32) -> (i32, i32) {
    %c0_i32 = arith.constant 0 : i32
    %c0_i32_0 = arith.constant 0 : i32
    %c0_i32_1 = arith.constant 0 : i32
    return %c0_i32, %c0_i32_0 : i32, i32
  }
  func.func @transform_6(%arg0: i32) -> (i32, i32) {
    %c0_i32 = arith.constant 0 : i32
    %c0_i32_0 = arith.constant 0 : i32
    %c0_i32_1 = arith.constant 0 : i32
    return %c0_i32, %c0_i32_0 : i32, i32
  }
  func.func @transform_7(%arg0: i32) -> (i32, i32, i32) {
    %c0_i32 = arith.constant 0 : i32
    %c0_i32_0 = arith.constant 0 : i32
    %c0_i32_1 = arith.constant 0 : i32
    return %arg0, %c0_i32, %c0_i32_0 : i32, i32, i32
  }
}

</mosaic_0001>

<bundles_post_ra>
// kernel: tpu_custom_call.1
= control target key start
LH: loop header
LB: loop body
LE: loop exit
PB: predicated region body
PF: predicated region fallthrough
CT: control target
= control target key end

     0   :  { %12 = vsyncpa [#allocation5], 0  ;;  %s1348_s0 = inlined_call_operand.hbm [shape: f32[2,16,256], index: 0, kind: input, shape index: {}]   ;;  %s1349_s1 = inlined_call_operand.vmem [shape: f32[4,16], index: 1, kind: input, shape index: {}]   ;;  %s1350_s2 = inlined_call_operand.vmem [shape: f32[4,72], index: 2, kind: input, shape index: {}]   ;;  %s1351_s3 = inlined_call_operand.vmem [shape: f32[16,4], index: 3, kind: input, shape index: {}]   ;;  %s1352_s4 = inlined_call_operand.vmem [shape: f32[4,1], index: 4, kind: input, shape index: {}]   ;;  %s1353_s5 = inlined_call_operand.vmem [shape: f32[4,1], index: 5, kind: input, shape index: {}]   ;;  %s1354_s6 = inlined_call_operand.vmem [shape: f32[16,1], index: 6, kind: input, shape index: {}]   ;;  %s1355_s7 = inlined_call_operand.hbm [shape: f32[2,16,256], index: 7, kind: output, shape index: {}]  }
   0x1   :  { %14 = vsyncpa [#allocation5 + $0x1], 0 }
   0x2   :  { %15 = vsyncpa [#allocation6], 0 }
   0x3   :  { %17 = vsyncpa [#allocation6 + $0x1], 0  ;;  %s1099_s24 = smov 0   ;;  %s1101_s25 = smov 0  }
   0x4   :  { %s1103_s26 = smov 0   ;;  %s1105_s27 = smov 0  }
   0x5 LB: > { %s1120_s28 = sadd.s32 4294967295, %s1042_s27   ;;  %s865_s29 = sadd.s32 4294967294, %s1042_s27   ;;  %s1042_s27 = sphi %s1105_s27, %s1370_s27   ;;  %s1038_s26 = sphi %s1103_s26, %s1369_s26   ;;  %s1034_s25 = sphi %s1101_s25, %s1368_s25   ;;  %s1030_s24 = sphi %s1099_s24, %s1367_s24  }
   0x6   : > { %s1124_s30 = sadd.s32 1, %s1042_s27   ;;  %s30_s8 = sadd.s32 1, %s1038_s26 }
   0x7   : > { %s27_s9 = ssub.s32 %s1042_s27, %s1124_s30  ;;  %p37_p0 = scmp.ne.s32.totalorder %s1038_s26, %s1034_s25 }
   0x8   : > { %p28_p1 = scmp.eq.s32.totalorder %s27_s9, 0  ;;  %p38_p2 = scmp.eq.s32.totalorder %s1042_s27, 0 }
   0x9   : > { %p43_p3 = scmp.ne.s32.totalorder %s1034_s25, %s1030_s24  ;;  %p44_p4 = scmp.eq.s32.totalorder %s1120_s28, 0 }
   0xa   : > { %s1136_s10 = scalar_select %p28_p1, %s1038_s26, %s30_s8  }
   0xb   : > { %p1138_p5 = por %p38_p2, %p37_p0  ;;  %p1142_p6 = por %p44_p4, %p43_p3 }
   0xc   : > { %p193_p7 = scmp.eq.s32.totalorder %s1120_s28, 1  ;;  %p199_p8 = scmp.eq.s32.totalorder %s865_s29, 1 }
   0xd   : > { %s1359_s12 = scalar_select %p1142_p6, 1, 0 }
   0xe   : > { %p899_p10 = scmp.lt.s32.totalorder %s1042_s27, 2  ;;  %p1149_p11 = por %p193_p7, %p37_p0 }
   0xf   : > { %p1153_p12 = por %p199_p8, %p43_p3  ;;  %s237_s15 = sand.u32 1, %s1038_s26  }
  0x10   : > { %s1360_s13 = scalar_select %p1149_p11, 1, 0 }
  0x11   : > { %s1361_s14 = scalar_select %p1153_p12, 1, 0 }
  0x12   : > { %s885_s16 = sshll.u32 %s1042_s27, 9  ;;  %s868_s17 = sshll.u32 %s237_s15, 5 }
  0x13   : > { %s1162_s20 = scalar_lea.hbm %s1348_s0, %s885_s16  ;;  %s241_s21 = scalar_lea.vmem [#allocation4], %s868_s17 }
  0x14   : > { %s248_s22 = sshll.u32 %s241_s21, 4  ;;  %p1166_p13 = pnand %p899_p10, %p1138_p5  ;;  %s1170_s22 = int_to_ptr.vmem [resolvable:$true] %s248_s22 }
  0x15   : > { %s1172_s29 = scalar_lea.sflag [#allocation5], %s237_s15  ;;  %s950_s8 = scalar_lea.hbm %s1162_s20, 512 }
  0x16   : > { %p951_p0 = scmp.ne.s32.totalorder %s1162_s20, %s950_s8  ;;  %p952_p1 = pneg %p1166_p13 }
  0x17   : > { %s955_s17 = scalar_lea.hbm %s1348_s0, 1024  ;;  %p956_p4 = scmp.lt.s32.totalorder %s1162_s20, %s1348_s0 }
  0x18   : > { %p953_p2 = pnand %p952_p1, %p951_p0  ;;  %p957_p5 = scmp.lt.s32.totalorder %s955_s17, %s950_s8 }
  0x1a   : > { %p954_p3 = pneg %p953_p2  ;;  %p958_p7 = por %p957_p5, %p956_p4 }
  0x1c   : > { %p959_p8 = pnand %p958_p7, %p954_p3 }
  0x1e   : > { %962 = shalt.err (!%p959_p8)
}
  0x1f   : > { %s963_s15 = scalar_lea.vmem %s1170_s22, 512  ;;  %s1044_s19 = smov [#allocation4]  }
  0x20   : > { %p964_p10 = scmp.ne.s32.totalorder %s1170_s22, %s963_s15  ;;  %s968_s21 = sshll.u32 %s1044_s19, 4  ;;  %s969_s21 = int_to_ptr.vmem [resolvable:$false] %s968_s21 }
  0x21   : > { %s970_s9 = scalar_lea.vmem %s969_s21, 1024  ;;  %p971_p2 = scmp.lt.s32.totalorder %s1170_s22, %s969_s21 }
  0x22   : > { %p966_p9 = pnand %p964_p10, %p952_p1  ;;  %p972_p12 = scmp.lt.s32.totalorder %s970_s9, %s963_s15 }
  0x24   : > { %p967_p0 = pneg %p966_p9  ;;  %p973_p11 = por %p972_p12, %p971_p2 }
  0x26   : > { %p974_p6 = pnand %p973_p11, %p967_p0 }
  0x28   : > { %977 = shalt.err (!%p974_p6)
}
  0x29   : > { %s1045_s8 = smov 256   ;;  %s1046_s16 = smov 16  }
  0x2a   : > { %894 = dma.hbm_to_vmem [thread:$0]  (!%p1166_p13), %s1162_s20, 512, %s1170_s22, %s1172_s29, %s1045_s8, %s1045_s8, %s1046_s16  }
  0x2b   : > { %p871_p9 = scmp.ge.s32.totalorder %s1042_s27, 1  ;;  %p256_p1 = scmp.lt.s32.totalorder %s1042_s27, 3 }
  0x2d   : > { %p257_p3 = pnand %p871_p9, %p256_p1 }
  0x2e   : > { %s1196_s17 = sand.u32 (!%p257_p3), 1, %s1034_s25   ;;  %p1363_p6 = scmp.ne.s32.totalorder (!%p257_p3), %s1359_s12, 0 }
  0x2f   : > { %260 = sbr.rel (%p257_p3) target bundleno = 846 (0x34e), region = 48  ;;  %s872_s11 = sshll.u32 (!%p257_p3), %s1196_s17, 5 }
  0x30   : > { %s263_s18 = scalar_lea.sflag (!%p257_p3), [#allocation5], %s1196_s17  ;;  %s1202_s15 = scalar_lea.vmem (!%p257_p3), [#allocation4], %s872_s11 }
  0x34   : > { %1021 = dma.done.wait (%p1363_p6), %s263_s18, 512  }
  0x35   : > { %1023 = vsyncadd (%p1363_p6), %s263_s18, 4294966784  ;;  %v1047_v0 = vmov 0.0   ;;  %v1048_v1 = vmov 0   ;;  %v1231_v2 = vld [vmem:[%s1202_s15 + $0x18] sm:$0xff]  ;;  %v1234_v3 = vld [vmem:[%s1202_s15 + $0x10] sm:$0xff]  ;;  %vm308_vm0 = vcmask 130048  }
  0x36   : > { %376 = vmatprep.mubr.f32.mxu0 %v1047_v0  ;;  %385 = vst [vmem:[#allocation2] sm:$0xff] %v1047_v0  ;;  %386 = vst [vmem:[#allocation2 + $0x8] sm:$0xff] %v1047_v0  ;;  %946 = vset.pattern.permute.xlu0 %v1048_v1  ;;  %v1237_v4 = vld [vmem:[%s1202_s15 + $0x8] sm:$0xff]  ;;  %v1241_v5 = vld [vmem:[%s1202_s15] sm:$0xff]  ;;  %s1049_s29 = smov 111   ;;  %s1050_s19 = smov 112  }
  0x37   : > { %392 = vst [vmem:[#allocation3] sm:$0xff] %v1047_v0  ;;  %393 = vst [vmem:[#allocation3 + $0x38] sm:$0xff] %v1047_v0  ;;  %652 = vmatprep.mubr.f32.mxu1 %v1047_v0  ;;  %947 = vset.pattern.permute.xlu1 %v1048_v1  ;;  %v302_v6 = vld [vmem:[%s1352_s4] sm:$0xf]  ;;  %s1051_s21 = smov 127   ;;  %s1052_s9 = smov 113  }
  0x38   : > { %394 = vst [vmem:[#allocation3 + $0x78] sm:$0xff] %v1047_v0  ;;  %395 = vst [vmem:[#allocation3 + $0x58] sm:$0xff] %v1047_v0  ;;  %340 = vmatprep.subr.mxu0 %v1231_v2  ;;  %v301_v7 = vld [vmem:[%s1349_s1] sm:$0xf]  ;;  %305 = vperm.xlu0 %946, %v302_v6   ;;  %s1053_s8 = smov 1   ;;  %s1054_s16 = smov 15  }
  0x39   : > { %396 = vst [vmem:[#allocation3 + $0x20] sm:$0xff] %v1047_v0  ;;  %397 = vst [vmem:[#allocation3 + $0x8] sm:$0xff] %v1047_v0  ;;  %341 = vmatpush1.msra.mxu0 %v1234_v3  ;;  %s1055_s18 = smov 16   ;;  %s1056_s15 = smov 17   ;;  %v578_v27 = vld [vmem:[%s1353_s5] sm:$0xf] }
  0x3a   : > { %398 = vst [vmem:[#allocation3 + $0x70] sm:$0xff] %v1047_v0  ;;  %399 = vst [vmem:[#allocation3 + $0x80] sm:$0xff] %v1047_v0  ;;  %342 = vmatprep.subr.mxu0 %v1237_v4  ;;  %v663_v28 = vld [vmem:[%s1354_s6] sm:$0xff]  ;;  %v664_v29 = vld [vmem:[%s1354_s6 + $0x8] sm:$0xff]  ;;  %vm552_vm1 = vcmask 908288   ;;  %vm516_vm2 = vcmask 924672  }
  0x3b   : > { %400 = vst [vmem:[#allocation3 + $0x88] sm:$0xff] %v1047_v0  ;;  %401 = vst [vmem:[#allocation3 + $0x40] sm:$0xff] %v1047_v0  ;;  %343 = vmatpush1.msra.mxu0 %v1241_v5  ;;  %vm534_vm3 = vcmask 916480   ;;  %vm474_vm4 = vcmask 7168   ;;  %vm498_vm5 = vcmask 1039360   ;;  %vm456_vm6 = vcmask 121856  }
  0x3c   : > { %402 = vst [vmem:[#allocation3 + $0x50] sm:$0xff] %v1047_v0  ;;  %403 = vst [vmem:[#allocation3 + $0x28] sm:$0xff] %v1047_v0  ;;  %874 = vmatmul.mubr.msk.f32.vlgmr.msra.gmra.mxu0 %vm308_vm0, %v301_v7  ;;  %vm421_vm7 = vcmask 138240   ;;  %vm584_vm8 = vcmask 588800   ;;  %vm682_vm9 = vcmask 1043456   ;;  %vm675_vm10 = vcmask 31744  }
  0x3d   : > { %404 = vst [vmem:[#allocation3 + $0x10] sm:$0xff] %v1047_v0  ;;  %405 = vst [vmem:[#allocation3 + $0x48] sm:$0xff] %v1047_v0  ;;  %753 = vmatprep.mubr.f32.mxu0 %v1047_v0  ;;  %v542_v8 = vld [vmem:[#allocation2 + $0xc] sm:$0xf]  ;;  %s296_s20 = scalar_lea.vmem [#allocation7], %s872_s11  ;;  %s886_s23 = sshll.u32 %s1120_s28, 9 }
  0x3e   : > { %406 = vst [vmem:[#allocation3 + $0x30] sm:$0xff] %v1047_v0  ;;  %407 = vst [vmem:[#allocation3 + $0x18] sm:$0xff] %v1047_v0  ;;  %550 = vrot.lane.b32.xlu1 %v542_v8, %s1049_s29  ;;  %v524_v9 = vld [vmem:[#allocation2 + $0xc] sm:$0xf]  ;;  %s792_s22 = sshll.u32 %s296_s20, 4  ;;  %p1364_p12 = scmp.ne.s32.totalorder %s1360_s13, 0  ;;  %s1299_s22 = int_to_ptr.vmem [resolvable:$true] %s792_s22 }
  0x3f   : > { %408 = vst [vmem:[#allocation3 + $0x68] sm:$0xff] %v1047_v0  ;;  %409 = vst [vmem:[#allocation3 + $0x60] sm:$0xff] %v1047_v0  ;;  %v488_v10 = vld [vmem:[#allocation2 + $0xc] sm:$0xf]  ;;  %s1057_s28 = smov [#allocation7]  }
  0x40   : > { %v506_v11 = vld [vmem:[#allocation2 + $0xc] sm:$0xf] }
  0x41   : > { %514 = vrot.lane.b32.xlu0 %v506_v11, %s1052_s9 }
  0x42   : > { %532 = vrot.lane.b32.xlu1 %v524_v9, %s1050_s19 }
  0x46   : > { %496 = vrot.lane.b32.xlu1 %v488_v10, %s1051_s21 }
  0xb0   : > { %v551_v30 = vpop.permute.xlu1 %550 }
  0xb3   : > { %v306_v12 = vpop.permute.xlu0 %305 }
  0xb4   : > { %v533_v31 = vpop.permute.xlu1 %532 }
  0xb7   : > { %v515_v33 = vpop.permute.xlu0 %514 }
  0xb8   : > { %v497_v32 = vpop.permute.xlu1 %496 }
  0xfc   : > { %v378_v13 = vpop.f32.mrf.mxu0 }
  0xfd   : > { %v379_v14 = vadd.f32 %v378_v13, %v306_v12 }
  0xfe   : > { %v380_v15 = vpop.f32.mrf.mxu0 }
  0xff   : > { %v381_v16 = vadd.f32 %v380_v15, %v306_v12  ;;  %v383_v17 = vmax.f32 %v379_v14, 0.0 }
 0x101   : > { %v384_v18 = vmax.f32 %v381_v16, 0.0 }
 0x103   : > { %v389_v19 = vcombine.low %v383_v17, %v384_v18  ;;  %v949_v20 = vcombine.low %v384_v18, %v384_v18 }
 0x105   : > { %391 = vst [vmem:[#allocation2 + $0x4] sm:$0xff] %v389_v19  ;;  %546 = vrot.lane.b32.xlu1 %v389_v19, %s1049_s29  ;;  %528 = vrot.lane.b32.xlu0 %v389_v19, %s1050_s19  ;;  %485 = vst [vmem:[#allocation3 + $0x88] sm:$0xf] %v389_v19 }
 0x106   : > { %486 = vst [vmem:[#allocation3 + $0x40] sm:$0xf] %v949_v20 }
 0x109   : > { %510 = vrot.lane.b32.xlu1 %v389_v19, %s1052_s9  ;;  %492 = vrot.lane.b32.xlu0 %v389_v19, %s1051_s21 }
 0x10c   : > { %v464_v21 = vld [vmem:[#allocation2 + $0x8] sm:$0xf]  ;;  %v463_v22 = vld [vmem:[#allocation2] sm:$0xff]  ;;  %v568_v19 = vld [vmem:[#allocation3 + $0x88] sm:$0xff] }
 0x10d   : > { %472 = vrot.lane.b32.xlu0 %v464_v21, %s1053_s8  ;;  %468 = vrot.lane.b32.xlu1 %v463_v22, %s1053_s8  ;;  %v446_v23 = vld [vmem:[#allocation2 + $0x8] sm:$0xf]  ;;  %v467_v25 = vcombine.high %v463_v22, %v463_v22  ;;  %v569_v17 = vld [vmem:[#allocation3 + $0x40] sm:$0xff] }
 0x10e   : > { %v429_v24 = vld [vmem:[#allocation2 + $0x8] sm:$0xf] }
 0x10f   : > { %v411_v26 = vld [vmem:[#allocation2 + $0x8] sm:$0xf] }
 0x111   : > { %454 = vrot.lane.b32.xlu1 %v446_v23, %s1054_s16  ;;  %450 = vrot.lane.b32.xlu0 %v463_v22, %s1054_s16 }
 0x115   : > { %437 = vrot.lane.b32.xlu0 %v429_v24, %s1055_s18  ;;  %433 = vrot.lane.b32.xlu1 %v463_v22, %s1055_s18 }
 0x119   : > { %548 = vrot.lane.b32.xlu0 %v949_v20, %s1049_s29  ;;  %512 = vrot.lane.b32.xlu1 %v949_v20, %s1052_s9  ;;  %s978_s9 = scalar_lea.vmem %s1299_s22, 512 }
 0x11a   : > { %p979_p11 = scmp.ne.s32.totalorder %s1299_s22, %s978_s9 }
 0x11c   : > { %p980_p13 = pnand %p979_p11, %p1364_p12 }
 0x11d   : > { %530 = vrot.lane.b32.xlu0 %v949_v20, %s1050_s19  ;;  %470 = vrot.lane.b32.xlu1 %v467_v25, %s1053_s8  ;;  %s1304_s19 = scalar_lea.hbm %s1355_s7, %s886_s23  ;;  %s982_s8 = sshll.u32 %s1057_s28, 4  ;;  %s983_s8 = int_to_ptr.vmem [resolvable:$false] %s982_s8 }
 0x11e   : > { %p981_p4 = pneg %p980_p13  ;;  %p985_p5 = scmp.lt.s32.totalorder %s1299_s22, %s983_s8 }
 0x121   : > { %494 = vrot.lane.b32.xlu0 %v949_v20, %s1051_s21  ;;  %435 = vrot.lane.b32.xlu1 %v467_v25, %s1055_s18  ;;  %s779_s21 = scalar_lea.sflag [#allocation6], %s1196_s17 }
 0x125   : > { %452 = vrot.lane.b32.xlu0 %v467_v25, %s1054_s16  ;;  %419 = vrot.lane.b32.xlu1 %v411_v26, %s1056_s15  ;;  %s984_s16 = scalar_lea.vmem %s983_s8, 1024 }
 0x126   : > { %p986_p7 = scmp.lt.s32.totalorder %s984_s16, %s978_s9 }
 0x128   : > { %p987_p8 = por %p986_p7, %p985_p5 }
 0x129   : > { %417 = vrot.lane.b32.xlu0 %v467_v25, %s1056_s15  ;;  %581 = vperm.xlu1 %947, %v578_v27  }
 0x12a   : > { %p988_p10 = pnand %p987_p8, %p981_p4 }
 0x12d   : > { %415 = vrot.lane.b32.xlu0 %v463_v22, %s1056_s15  ;;  %672 = vperm.xlu1 %947, %v664_v29  }
 0x131   : > { %667 = vperm.xlu0 %946, %v663_v28   ;;  %v559_v28 = vld [vmem:[%s1350_s2] sm:$0xf] }
 0x177   : > { %v547_v34 = vpop.permute.xlu1 %546  ;;  %v529_v35 = vpop.permute.xlu0 %528 }
 0x17b   : > { %v511_v36 = vpop.permute.xlu1 %510  ;;  %v493_v37 = vpop.permute.xlu0 %492 }
 0x17f   : > { %v473_v38 = vpop.permute.xlu0 %472  ;;  %v469_v39 = vpop.permute.xlu1 %468 }
 0x183   : > { %v455_v40 = vpop.permute.xlu1 %454  ;;  %v451_v41 = vpop.permute.xlu0 %450 }
 0x187   : > { %v438_v42 = vpop.permute.xlu0 %437  ;;  %v434_v43 = vpop.permute.xlu1 %433 }
 0x18b   : > { %v549_v44 = vpop.permute.xlu0 %548  ;;  %v513_v45 = vpop.permute.xlu1 %512 }
 0x18c   : > { %v553_v46 = vsel %vm552_vm1, %v547_v34, %v549_v44  ;;  %v554_v47 = vsel %vm552_vm1, %v549_v44, %v551_v30  ;;  %v517_v48 = vsel %vm516_vm2, %v511_v36, %v513_v45  ;;  %v518_v49 = vsel %vm516_vm2, %v513_v45, %v515_v33 }
 0x18d   : > { %557 = vst [vmem:[#allocation3 + $0x68] sm:$0xf] %v553_v46  ;;  %558 = vst [vmem:[#allocation3 + $0x60] sm:$0xf] %v554_v47 }
 0x18e   : > { %521 = vst [vmem:[#allocation3 + $0x10] sm:$0xf] %v517_v48  ;;  %522 = vst [vmem:[#allocation3 + $0x48] sm:$0xf] %v518_v49 }
 0x18f   : > { %v531_v50 = vpop.permute.xlu0 %530  ;;  %v471_v51 = vpop.permute.xlu1 %470 }
 0x190   : > { %v535_v52 = vsel %vm534_vm3, %v529_v35, %v531_v50  ;;  %v536_v53 = vsel %vm534_vm3, %v531_v50, %v533_v31  ;;  %v475_v54 = vsel %vm474_vm4, %v469_v39, %v471_v51  ;;  %v476_v55 = vsel %vm474_vm4, %v471_v51, %v473_v38  ;;  %v662_v38 = vld [vmem:[%s1351_s3 + $0x8] sm:$0xff] }
 0x191   : > { %539 = vst [vmem:[#allocation3 + $0x30] sm:$0xf] %v535_v52  ;;  %540 = vst [vmem:[#allocation3 + $0x18] sm:$0xf] %v536_v53 }
 0x192   : > { %479 = vst [vmem:[#allocation3 + $0x70] sm:$0xf] %v475_v54  ;;  %480 = vst [vmem:[#allocation3 + $0x80] sm:$0xf] %v476_v55 }
 0x193   : > { %v495_v56 = vpop.permute.xlu0 %494  ;;  %v436_v57 = vpop.permute.xlu1 %435 }
 0x194   : > { %v499_v58 = vsel %vm498_vm5, %v493_v37, %v495_v56  ;;  %v500_v59 = vsel %vm498_vm5, %v495_v56, %v497_v32  ;;  %v439_v60 = vsel %vm308_vm0, %v434_v43, %v436_v57  ;;  %v440_v61 = vsel %vm308_vm0, %v436_v57, %v438_v42  ;;  %v577_v62 = vld [vmem:[#allocation3 + $0x60] sm:$0xff]  ;;  %v576_v63 = vld [vmem:[#allocation3 + $0x68] sm:$0xff]  ;;  %v661_v37 = vld [vmem:[%s1351_s3] sm:$0xff] }
 0x195   : > { %503 = vst [vmem:[#allocation3 + $0x50] sm:$0xf] %v499_v58  ;;  %504 = vst [vmem:[#allocation3 + $0x28] sm:$0xf] %v500_v59  ;;  %602 = vmatprep.subr.mxu1 %v577_v62  ;;  %v573_v10 = vld [vmem:[#allocation3 + $0x48] sm:$0xff]  ;;  %v572_v13 = vld [vmem:[#allocation3 + $0x10] sm:$0xff] }
 0x196   : > { %443 = vst [vmem:[#allocation3 + $0x78] sm:$0xf] %v439_v60  ;;  %444 = vst [vmem:[#allocation3 + $0x58] sm:$0xf] %v440_v61  ;;  %603 = vmatpush1.msra.mxu1 %v576_v63 }
 0x197   : > { %v453_v1 = vpop.permute.xlu0 %452  ;;  %v420_v11 = vpop.permute.xlu1 %419 }
 0x198   : > { %v457_v6 = vsel %vm456_vm6, %v451_v41, %v453_v1  ;;  %v458_v7 = vsel %vm456_vm6, %v453_v1, %v455_v40  ;;  %v575_v8 = vld [vmem:[#allocation3 + $0x18] sm:$0xff]  ;;  %v574_v9 = vld [vmem:[#allocation3 + $0x30] sm:$0xff] }
 0x199   : > { %461 = vst [vmem:[#allocation3 + $0x20] sm:$0xf] %v457_v6  ;;  %462 = vst [vmem:[#allocation3 + $0x8] sm:$0xf] %v458_v7  ;;  %604 = vmatprep.subr.mxu1 %v575_v8  ;;  %v567_v21 = vld [vmem:[#allocation3 + $0x80] sm:$0xff]  ;;  %v566_v22 = vld [vmem:[#allocation3 + $0x70] sm:$0xff] }
 0x19a   : > { %605 = vmatpush1.msra.mxu1 %v574_v9 }
 0x19b   : > { %606 = vmatprep.subr.mxu1 %v573_v10  ;;  %v418_v12 = vpop.permute.xlu0 %417 }
 0x19c   : > { %v423_v14 = vsel %vm421_vm7, %v418_v12, %v420_v11  ;;  %607 = vmatpush1.msra.mxu1 %v572_v13  ;;  %v571_v15 = vld [vmem:[#allocation3 + $0x28] sm:$0xff]  ;;  %v570_v16 = vld [vmem:[#allocation3 + $0x50] sm:$0xff] }
 0x19d   : > { %427 = vst [vmem:[#allocation3 + $0x38] sm:$0xf] %v423_v14  ;;  %608 = vmatprep.subr.mxu1 %v571_v15  ;;  %v563_v25 = vld [vmem:[#allocation3 + $0x58] sm:$0xff] }
 0x19e   : > { %609 = vmatpush1.msra.mxu1 %v570_v16  ;;  %v562_v26 = vld [vmem:[#allocation3 + $0x78] sm:$0xff] }
 0x19f   : > { %610 = vmatprep.subr.mxu1 %v569_v17  ;;  %v416_v18 = vpop.permute.xlu0 %415 }
 0x1a0   : > { %v422_v20 = vsel %vm421_vm7, %v416_v18, %v418_v12  ;;  %611 = vmatpush1.msra.mxu1 %v568_v19  ;;  %v565_v23 = vld [vmem:[#allocation3 + $0x8] sm:$0xff]  ;;  %v564_v24 = vld [vmem:[#allocation3 + $0x20] sm:$0xff] }
 0x1a1   : > { %426 = vst [vmem:[#allocation3] sm:$0xf] %v422_v20  ;;  %612 = vmatprep.subr.mxu1 %v567_v21 }
 0x1a2   : > { %613 = vmatpush1.msra.mxu1 %v566_v22 }
 0x1a3   : > { %614 = vmatprep.subr.mxu1 %v565_v23 }
 0x1a4   : > { %615 = vmatpush1.msra.mxu1 %v564_v24  ;;  %v561_v27 = vld [vmem:[#allocation3 + $0x38] sm:$0xff]  ;;  %v582_v31 = vpop.permute.xlu1 %581 }
 0x1a5   : > { %616 = vmatprep.subr.mxu1 %v563_v25 }
 0x1a6   : > { %617 = vmatpush1.msra.mxu1 %v562_v26 }
 0x1a7   : > { %618 = vmatprep.subr.mxu1 %v561_v27 }
 0x1a8   : > { %v560_v29 = vld [vmem:[#allocation3] sm:$0xff]  ;;  %v673_v45 = vpop.permute.xlu1 %672 }
 0x1a9   : > { %619 = vmatpush1.msra.mxu1 %v560_v29 }
 0x1aa   : > { %875 = vmatmul.mubr.msk.f32.vlgmr.msra.gmra.mxu1 %vm584_vm8, %v559_v28 }
 0x1ac   : > { %v668_v39 = vpop.permute.xlu0 %667 }
 0x26a   : > { %v654_v30 = vpop.f32.mrf.mxu1 }
 0x26b   : > { %v655_v32 = vadd.f32 %v654_v30, %v582_v31 }
 0x26c   : > { %v656_v33 = vpop.f32.mrf.mxu1 }
 0x26d   : > { %v657_v34 = vadd.f32 %v656_v33, %v582_v31  ;;  %v659_v36 = vmax.f32 %v655_v32, 0.0 }
 0x26f   : > { %v660_v35 = vmax.f32 %v657_v34, 0.0 }
 0x271   : > { %876 = vmatprep.subr.msk.mxu0 %vm682_vm9, %v660_v35 }
 0x272   : > { %877 = vmatpush1.msk.msra.mxu0 %vm682_vm9, %v659_v36 }
 0x273   : > { %878 = vmatmul.mubr.msk.f32.vlgmr.msra.gmra.mxu0 %vm675_vm10, %v661_v37 }
 0x274   : > { %759 = vmatprep.mubr.f32.mxu0 %v1047_v0 }
 0x277   : > { %879 = vmatmul.mubr.msk.f32.gmra.mxu0 %vm675_vm10, %v662_v38 }
 0x333   : > { %v755_v40 = vpop.f32.mrf.mxu0 }
 0x334   : > { %v756_v41 = vadd.f32 %v755_v40, %v668_v39 }
 0x335   : > { %v757_v42 = vpop.f32.mrf.mxu0 }
 0x336   : > { %v766_v43 = vadd.f32 %v756_v41, %v1241_v5  ;;  %v758_v44 = vadd.f32 %v757_v42, %v668_v39 }
 0x337   : > { %v761_v46 = vpop.f32.mrf.mxu0 }
 0x338   : > { %v770_v47 = vmax.f32 %v766_v43, 0.0  ;;  %v767_v48 = vadd.f32 %v758_v44, %v1237_v4  ;;  %v762_v49 = vadd.f32 %v761_v46, %v673_v45 }
 0x339   : > { %v763_v0 = vpop.f32.mrf.mxu0 }
 0x33a   : > { %774 = vst [vmem:[%s296_s20] sm:$0xff] %v770_v47  ;;  %v771_v50 = vmax.f32 %v767_v48, 0.0  ;;  %v768_v51 = vadd.f32 %v762_v49, %v1234_v3  ;;  %v764_v52 = vadd.f32 %v763_v0, %v673_v45 }
 0x33c   : > { %775 = vst [vmem:[%s296_s20 + $0x8] sm:$0xff] %v771_v50  ;;  %v772_v5 = vmax.f32 %v768_v51, 0.0  ;;  %v769_v53 = vadd.f32 %v764_v52, %v1231_v2 }
 0x33e   : > { %776 = vst [vmem:[%s296_s20 + $0x10] sm:$0xff] %v772_v5  ;;  %v773_v4 = vmax.f32 %v769_v53, 0.0 }
 0x340   : > { %777 = vst [vmem:[%s296_s20 + $0x18] sm:$0xff] %v773_v4 }
 0x341   : > { %991 = shalt.err (!%p988_p10)
}
 0x342   : > { %s992_s15 = scalar_lea.hbm %s1304_s19, 512  ;;  %s996_s23 = scalar_lea.hbm %s1355_s7, 1024 }
 0x343   : > { %p993_p0 = scmp.ne.s32.totalorder %s1304_s19, %s992_s15  ;;  %p997_p1 = scmp.lt.s32.totalorder %s1304_s19, %s1355_s7 }
 0x344   : > { %p998_p3 = scmp.lt.s32.totalorder %s996_s23, %s992_s15 }
 0x345   : > { %p994_p2 = pnand %p993_p0, %p1364_p12 }
 0x346   : > { %p999_p6 = por %p998_p3, %p997_p1 }
 0x347   : > { %p995_p9 = pneg %p994_p2 }
 0x349   : > { %p1000_p11 = pnand %p999_p6, %p995_p9 }
 0x34b   : > { %1003 = shalt.err (!%p1000_p11)
}
 0x34c   : > { %s1058_s9 = smov 256  }
 0x34d   : > { %889 = dma.vmem_to_hbm [thread:$0]  (%p1364_p12), %s1299_s22, 512, %s1304_s19, %s779_s21, %s1058_s9, %s1058_s9, %s1055_s18  }
 0x34e PF: > { %s807_s28 = sand.u32 1, %s1030_s24   ;;  %p1365_p13 = scmp.ne.s32.totalorder %s1361_s14, 0 }
 0x34f   : > { %p1366_p4 = scmp.ge.s32.totalorder %s1042_s27, 2  ;;  %s808_s8 = scalar_lea.sflag [#allocation6], %s807_s28 }
 0x351   : > { %p896_p5 = pnand %p1366_p4, %p1365_p13 }
 0x353   : > { %p897_p7 = pneg %p896_p5 }
 0x355   : > { %1025 = dma.done.wait (%p897_p7), %s808_s8, 512  }
 0x356   : > { %1027 = vsyncadd (%p897_p7), %s808_s8, 4294966784  ;;  %p20_p8 = scmp.ge.s32.totalorder %s1124_s30, 4   ;;  %s1367_s24 = smov %s1034_s25 }
 0x357   : > { %s1368_s25 = smov %s1038_s26  ;;  %s1369_s26 = smov %s1136_s10 }
 0x358   : > { %s1370_s27 = smov %s1124_s30  ;;  %22 = sbr.rel (!%p20_p8) target bundleno = 5 (0x5), region = 93 }
 0x35d   :  { %813 = vsyncpa [#allocation5], 1 }
 0x35e   :  { %815 = vsyncpa [#allocation5 + $0x1], 1 }
 0x35f   :  { %816 = vsyncpa [#allocation6], 1 }
 0x360   :  { %818 = vsyncpa [#allocation6 + $0x1], 1 }

</bundles_post_ra>
